<compile_context>
chip_gen: v6e
topology: v6e:2x2x1
jax: 0.10.0
libtpu: 0.0.40
codegen_flags: <defaults>
</compile_context>

<pallas_src>
import jax
import jax.numpy as jnp
import numpy as np
from jax.experimental import pallas as pl
from jax.experimental.pallas import tpu as pltpu


def _round_up(x: int, m: int) -> int:
    return ((x + m - 1) // m) * m


# ----------------------------------------------------------------------------
# Kernel 1: transposed node projection   h_t = W @ x_t + b      (nn.Linear)
#   w_ref : (H, H)  bf16   (torch layout [out, in], zero padded to H_pad)
#   x_ref : (H, tn) bf16   (features of a tile of `tn` nodes, transposed)
#   b_ref : (H, 1)  f32
#   o_ref : (H, tn) bf16
# ----------------------------------------------------------------------------
def _linear_t_kernel(w_ref, x_ref, b_ref, o_ref):
    acc = jnp.dot(w_ref[...], x_ref[...], preferred_element_type=jnp.float32)
    o_ref[...] = (acc + b_ref[...]).astype(o_ref.dtype)


def linear_project_t(x_t, w, b_col, *, tn):
    """x_t: (H_pad, N_pad) bf16, w: (H_pad, H_pad) bf16, b_col: (H_pad, 1) f32."""
    h, n = x_t.shape
    assert h % 128 == 0 and n % tn == 0  # guaranteed by wrapper-side padding
    # TODO(synk): for large hid_dim (H_pad >= ~4096 on v7x's 64 MiB VMEM) the
    # full-weight block must be split along K (extra "arbitrary" grid axis with
    # an f32 accumulator scratch + pl.when init/finalize).
    cost = pl.CostEstimate(
        flops=2 * h * h * n,
        transcendentals=0,
        bytes_accessed=2 * h * n + 2 * h * h + 4 * h + 2 * h * n)
    return pl.pallas_call(
        _linear_t_kernel,
        out_shape=jax.ShapeDtypeStruct((h, n), jnp.bfloat16),
        grid_spec=pltpu.PrefetchScalarGridSpec(
            num_scalar_prefetch=0,
            grid=(n // tn,),
            in_specs=[
                pl.BlockSpec((h, h), lambda i: (0, 0)),    # weight (VMEM resident)
                pl.BlockSpec((h, tn), lambda i: (0, i)),   # node tile
                pl.BlockSpec((h, 1), lambda i: (0, 0)),    # bias  (VMEM resident)
            ],
            out_specs=pl.BlockSpec((h, tn), lambda i: (0, i)),
        ),
        compiler_params=pltpu.CompilerParams(
            dimension_semantics=("parallel",),
            vmem_limit_bytes=32 * 1024 * 1024),
        cost_estimate=cost,
    )(w, x_t, b_col)


# ----------------------------------------------------------------------------
# Kernel 2: per-edge dot product + sigmoid  (fn.u_dot_v + nn.Sigmoid)
#   hu_ref / hv_ref : (H, te) bf16    (gathered endpoint features, transposed)
#   o_ref           : (1, te) f32     (lane-dense score row)
# ----------------------------------------------------------------------------
def _edge_score_kernel(hu_ref, hv_ref, o_ref):
    prod = hu_ref[...].astype(jnp.float32) * hv_ref[...].astype(jnp.float32)
    score = jnp.sum(prod, axis=0, keepdims=True)          # (1, te), lane dense
    o_ref[...] = jax.nn.sigmoid(score).astype(o_ref.dtype)


def edge_scores_t(hu_t, hv_t, *, te):
    h, e = hu_t.shape
    assert h % 128 == 0 and e % te == 0
    cost = pl.CostEstimate(
        flops=2 * h * e,
        transcendentals=e,
        bytes_accessed=2 * (2 * h * e) + 4 * e)
    return pl.pallas_call(
        _edge_score_kernel,
        out_shape=jax.ShapeDtypeStruct((1, e), jnp.float32),
        grid_spec=pltpu.PrefetchScalarGridSpec(
            num_scalar_prefetch=0,
            grid=(e // te,),
            in_specs=[
                pl.BlockSpec((h, te), lambda i: (0, i)),
                pl.BlockSpec((h, te), lambda i: (0, i)),
            ],
            out_specs=pl.BlockSpec((1, te), lambda i: (0, i)),
        ),
        compiler_params=pltpu.CompilerParams(
            dimension_semantics=("parallel",),
            vmem_limit_bytes=32 * 1024 * 1024),
        cost_estimate=cost,
    )(hu_t, hv_t)


# ----------------------------------------------------------------------------
# Module wrapper
# ----------------------------------------------------------------------------
class LinkScorePredictor:
    """Pallas version of moge's LinkScorePredictor (nn.Linear + u_dot_v + sigmoid)."""

    def __init__(self, hid_dim, key):
        kw, kb = jax.random.split(key)
        # nn.Linear(hid_dim, hid_dim): weight [out, in], bias [out]
        bound = 1.0 / np.sqrt(hid_dim)
        w = jax.random.uniform(kw, (hid_dim, hid_dim), jnp.float32, -bound, bound)
        b = jax.random.uniform(kb, (hid_dim,), jnp.float32, -bound, bound)
        self.hid_dim = hid_dim
        self.h_pad = max(128, _round_up(hid_dim, 128))     # lane-pad hidden dim
        # f32 originals (reference / checkpoint parity)
        self.w_f32 = w
        self.b_f32 = b
        # padded bf16 storage used by the kernels
        w_pad = jnp.zeros((self.h_pad, self.h_pad), jnp.float32)
        w_pad = w_pad.at[:hid_dim, :hid_dim].set(w)
        b_pad = jnp.zeros((self.h_pad,), jnp.float32).at[:hid_dim].set(b)
        self.w_bf16 = w_pad.astype(jnp.bfloat16)
        self.b_col = b_pad[:, None]                        # (H_pad, 1) f32

    def _project(self, x):
        n, h = x.shape
        assert h == self.hid_dim
        tn = min(512, _round_up(n, 128))
        n_pad = _round_up(n, tn)
        x_t = jnp.zeros((self.h_pad, n_pad), jnp.bfloat16)
        x_t = x_t.at[:h, :n].set(x.T.astype(jnp.bfloat16))
        return linear_project_t(x_t, self.w_bf16, self.b_col, tn=tn)

    def __call__(self, src_ids, dst_ids, x_src, x_dst):
        """
        src_ids, dst_ids : int32 [E]        endpoints of the predicted etype's edges
        x_src            : f32 [N_src, H]   source node-type features
        x_dst            : f32 [N_dst, H]   destination node-type features
        returns          : f32 [E, 1]       sigmoid(u . v)   (DGL 'score' edata)
        """
        h_src_t = self._project(x_src)        # (H_pad, N_src_pad) bf16
        h_dst_t = self._project(x_dst)        # (H_pad, N_dst_pad) bf16

        e = src_ids.shape[0]
        te = min(1024, _round_up(e, 128))
        e_pad = _round_up(e, te)
        src_pad = jnp.zeros((e_pad,), jnp.int32).at[:e].set(src_ids)
        dst_pad = jnp.zeros((e_pad,), jnp.int32).at[:e].set(dst_ids)

        # TODO(synk): the endpoint gather stays in XLA; fusing it into the edge
        # kernel (scalar-prefetched ids + manual DMA row gather from HBM-resident
        # h tables) would remove one (E, H) HBM round-trip per endpoint for E >> N.
        hu_t = jnp.take(h_src_t, src_pad, axis=1)   # (H_pad, E_pad) bf16
        hv_t = jnp.take(h_dst_t, dst_pad, axis=1)

        scores = edge_scores_t(hu_t, hv_t, te=te)   # (1, E_pad) f32, lane dense
        return scores[0, :e][:, None]               # (E, 1), matches DGL edata


# ----------------------------------------------------------------------------
if __name__ == "__main__":
    key = jax.random.PRNGKey(0)
    k_param, k_xs, k_xd, k_es, k_ed = jax.random.split(key, 5)

    hid_dim = 32
    n_src, n_dst, n_edges = 16, 16, 8

    x_src = jax.random.normal(k_xs, (n_src, hid_dim), jnp.float32)
    x_dst = jax.random.normal(k_xd, (n_dst, hid_dim), jnp.float32)
    src_ids = jax.random.randint(k_es, (n_edges,), 0, n_src, jnp.int32)
    dst_ids = jax.random.randint(k_ed, (n_edges,), 0, n_dst, jnp.int32)

    model = LinkScorePredictor(hid_dim, k_param)
    scores = model(src_ids, dst_ids, x_src, x_dst)
    scores = jax.block_until_ready(scores)

    # pure-JAX f32 reference (kernels use bf16 storage -> loose tolerance)
    h_src_ref = x_src @ model.w_f32.T + model.b_f32
    h_dst_ref = x_dst @ model.w_f32.T + model.b_f32
    ref = jax.nn.sigmoid(
        jnp.sum(h_src_ref[src_ids] * h_dst_ref[dst_ids], axis=-1, keepdims=True))
    np.testing.assert_allclose(np.asarray(scores), np.asarray(ref),
                               rtol=2e-2, atol=2e-2)
    assert scores.shape == (n_edges, 1)

    print("KERNEL_OK")
</pallas_src>

<mosaic_0001>
module attributes {stable_mosaic.version = 11 : i64} {
  func.func @_linear_t_kernel(%arg0: i32, %arg1: memref<128x128xbf16, #tpu.memory_space<vmem>>, %arg2: memref<128x128xbf16, #tpu.memory_space<vmem>>, %arg3: memref<128x1xf32, #tpu.memory_space<vmem>>, %arg4: memref<128x128xbf16, #tpu.memory_space<vmem>>) attributes {dimension_semantics = [#tpu.dimension_semantics<parallel>], iteration_bounds = array<i64: 1>, scalar_prefetch = 0 : i64, scratch_operands = 0 : i64, tpu.core_type = #tpu.core_type<tc>, window_params = [{pipeline_mode = #tpu.pipeline_mode<synchronous>, transform_indices = @transform_0, window_bounds = array<i64: 128, 128>}, {transform_indices = @transform_1, window_bounds = array<i64: 128, 128>}, {pipeline_mode = #tpu.pipeline_mode<synchronous>, transform_indices = @transform_2, window_bounds = array<i64: 128, 1>}, {transform_indices = @transform_3, window_bounds = array<i64: 128, 128>}]} {
    %c0 = arith.constant 0 : index
    %c0_0 = arith.constant 0 : index
    %0 = vector.load %arg1[%c0, %c0_0] : memref<128x128xbf16, #tpu.memory_space<vmem>>, vector<128x128xbf16>
    %c0_1 = arith.constant 0 : index
    %c0_2 = arith.constant 0 : index
    %1 = vector.load %arg2[%c0_1, %c0_2] : memref<128x128xbf16, #tpu.memory_space<vmem>>, vector<128x128xbf16>
    %cst = arith.constant dense<0.000000e+00> : vector<128x128xf32>
    %2 = tpu.matmul %0, %1, %cst {dimension_numbers = #tpu.dot_dimension_numbers<[1], [0], [0], [1], [0, 0, 1, 1], [], []>} : vector<128x128xbf16>, vector<128x128xbf16>, vector<128x128xf32> -> vector<128x128xf32>
    %c0_3 = arith.constant 0 : index
    %c0_4 = arith.constant 0 : index
    %3 = vector.load %arg3[%c0_3, %c0_4] : memref<128x1xf32, #tpu.memory_space<vmem>>, vector<128x1xf32>
    %4 = vector.broadcast %3 : vector<128x1xf32> to vector<128x128xf32>
    %5 = arith.addf %2, %4 : vector<128x128xf32>
    %6 = arith.truncf %5 : vector<128x128xf32> to vector<128x128xbf16>
    %c0_5 = arith.constant 0 : index
    %c0_6 = arith.constant 0 : index
    %7 = vector.load %arg4[%c0_5, %c0_6] : memref<128x128xbf16, #tpu.memory_space<vmem>>, vector<128x128xbf16>
    tpu.vector_store %arg4[%c0_5, %c0_6], %6 {strides = array<i32>} : memref<128x128xbf16, #tpu.memory_space<vmem>>, vector<128x128xbf16>,
    return
  }
  func.func @transform_0(%arg0: i32) -> (i32, i32) {
    %c0_i32 = arith.constant 0 : i32
    %c0_i32_0 = arith.constant 0 : i32
    %c0_i32_1 = arith.constant 0 : i32
    return %c0_i32, %c0_i32_0 : i32, i32
  }
  func.func @transform_1(%arg0: i32) -> (i32, i32) {
    %c0_i32 = arith.constant 0 : i32
    %c0_i32_0 = arith.constant 0 : i32
    return %c0_i32, %arg0 : i32, i32
  }
  func.func @transform_2(%arg0: i32) -> (i32, i32) {
    %c0_i32 = arith.constant 0 : i32
    %c0_i32_0 = arith.constant 0 : i32
    %c0_i32_1 = arith.constant 0 : i32
    return %c0_i32, %c0_i32_0 : i32, i32
  }
  func.func @transform_3(%arg0: i32) -> (i32, i32) {
    %c0_i32 = arith.constant 0 : i32
    %c0_i32_0 = arith.constant 0 : i32
    return %c0_i32, %arg0 : i32, i32
  }
}

</mosaic_0001>

<bundles_post_ra>
// kernel: tpu_custom_call.1
= control target key start
LH: loop header
LB: loop body
LE: loop exit
PB: predicated region body
PF: predicated region fallthrough
CT: control target
= control target key end

     0   :  { %v636_v2 = vmov 0   ;;  %s759_s0 = inlined_call_operand.vmem [shape: bf16[128,128], index: 0, kind: input, shape index: {}]   ;;  %s760_s1 = inlined_call_operand.vmem [shape: bf16[128,128], index: 1, kind: input, shape index: {}]   ;;  %s761_s2 = inlined_call_operand.vmem [shape: f32[128,1], index: 2, kind: input, shape index: {}]   ;;  %s762_s3 = inlined_call_operand.hbm [shape: bf16[128,128], index: 3, kind: output, shape index: {}]  }
   0x1   :  { %v598_v0 = vld [vmem:[%s760_s1 + $0x38] sm:$0xff]   ;;  %v599_v1 = vld [vmem:[%s760_s1 + $0x30] sm:$0xff]   ;;  %597 = vset.pattern.permute.xlu1 %v636_v2  ;;  %596 = vset.pattern.permute.xlu0 %v636_v2  ;;  %v600_v3 = vld [vmem:[%s760_s1 + $0x28] sm:$0xff]  }
   0x2   :  { %544 = vmatprep.subr.bf16.mxu0 %v598_v0  ;;  %576 = vmatprep.subr.bf16.mxu1 %v598_v0  ;;  %v601_v4 = vld [vmem:[%s760_s1 + $0x20] sm:$0xff]   ;;  %v602_v7 = vld [vmem:[%s760_s1 + $0x18] sm:$0xff]   ;;  %v603_v8 = vld [vmem:[%s760_s1 + $0x10] sm:$0xff]  }
   0x3   :  { %545 = vmatpush3.bf16.msra.mxu0 %v598_v0  ;;  %584 = vmatpush3.bf16.msra.mxu1 %v598_v0  ;;  %v606_v5 = vld [vmem:[%s759_s0] sm:$0xff]   ;;  %v50_v9 = vld [vmem:[%s761_s2 + $0x10] sm:$0xff]  ;;  %v51_v11 = vld [vmem:[%s761_s2 + $0x18] sm:$0xff] }
   0x4   :  { %546 = vmatprep.subr.bf16.mxu0 %v599_v1  ;;  %577 = vmatprep.subr.bf16.mxu1 %v599_v1  ;;  %v607_v6 = vld [vmem:[%s759_s0 + $0x20] sm:$0xff]   ;;  %v49_v12 = vld [vmem:[%s761_s2 + $0x8] sm:$0xff] }
   0x5   :  { %560 = vmatprep.mubr.bf16.mxu0 %v606_v5  ;;  %568 = vmatprep.mubr.bf16.mxu1 %v607_v6  ;;  %v48_v10 = vld [vmem:[%s761_s2] sm:$0xff]  ;;  %v604_v13 = vld [vmem:[%s760_s1 + $0x8] sm:$0xff]  }
   0x6   :  { %76 = vperm.xlu1 %597, %v50_v9   ;;  %66 = vperm.xlu0 %596, %v48_v10  }
   0x7   :  { %547 = vmatpush3.bf16.msra.mxu0 %v599_v1  ;;  %585 = vmatpush3.bf16.msra.mxu1 %v599_v1 }
   0x8   :  { %548 = vmatprep.subr.bf16.mxu0 %v600_v3  ;;  %578 = vmatprep.subr.bf16.mxu1 %v600_v3 }
   0xa   :  { %81 = vperm.xlu1 %597, %v51_v11   ;;  %71 = vperm.xlu0 %596, %v49_v12  }
   0xb   :  { %549 = vmatpush3.bf16.msra.mxu0 %v600_v3  ;;  %586 = vmatpush3.bf16.msra.mxu1 %v600_v3 }
   0xc   :  { %550 = vmatprep.subr.bf16.mxu0 %v601_v4  ;;  %579 = vmatprep.subr.bf16.mxu1 %v601_v4 }
   0xf   :  { %551 = vmatpush3.bf16.msra.mxu0 %v601_v4  ;;  %587 = vmatpush3.bf16.msra.mxu1 %v601_v4 }
  0x10   :  { %552 = vmatprep.subr.bf16.mxu0 %v602_v7  ;;  %580 = vmatprep.subr.bf16.mxu1 %v602_v7 }
  0x13   :  { %553 = vmatpush3.bf16.msra.mxu0 %v602_v7  ;;  %588 = vmatpush3.bf16.msra.mxu1 %v602_v7 }
  0x14   :  { %554 = vmatprep.subr.bf16.mxu0 %v603_v8  ;;  %581 = vmatprep.subr.bf16.mxu1 %v603_v8 }
  0x15   :  { %8 = vsyncpa [#allocation3], 0  ;;  %v53_v14 = vld [vmem:[%s761_s2 + $0x28] sm:$0xff]  ;;  %v52_v15 = vld [vmem:[%s761_s2 + $0x20] sm:$0xff] }
  0x16   :  { %v605_v16 = vld [vmem:[%s760_s1] sm:$0xff]   ;;  %91 = vperm.xlu1 %597, %v53_v14   ;;  %86 = vperm.xlu0 %596, %v52_v15   ;;  %v55_v17 = vld [vmem:[%s761_s2 + $0x38] sm:$0xff]  ;;  %v54_v18 = vld [vmem:[%s761_s2 + $0x30] sm:$0xff] }
  0x17   :  { %555 = vmatpush3.bf16.msra.mxu0 %v603_v8  ;;  %589 = vmatpush3.bf16.msra.mxu1 %v603_v8  ;;  %v608_v19 = vld [vmem:[%s759_s0 + $0x8] sm:$0xff]   ;;  %v56_v22 = vld [vmem:[%s761_s2 + $0x40] sm:$0xff]  ;;  %v610_v23 = vld [vmem:[%s759_s0 + $0x10] sm:$0xff]  }
  0x18   :  { %556 = vmatprep.subr.bf16.mxu0 %v604_v13  ;;  %582 = vmatprep.subr.bf16.mxu1 %v604_v13  ;;  %v609_v20 = vld [vmem:[%s759_s0 + $0x28] sm:$0xff]   ;;  %v611_v24 = vld [vmem:[%s759_s0 + $0x30] sm:$0xff]   ;;  %v59_v25 = vld [vmem:[%s761_s2 + $0x58] sm:$0xff] }
  0x19   :  { %v57_v21 = vld [vmem:[%s761_s2 + $0x48] sm:$0xff]  ;;  %v58_v26 = vld [vmem:[%s761_s2 + $0x50] sm:$0xff]  ;;  %v612_v27 = vld [vmem:[%s759_s0 + $0x18] sm:$0xff]  }
  0x1a   :  { %101 = vperm.xlu1 %597, %v55_v17   ;;  %96 = vperm.xlu0 %596, %v54_v18   ;;  %v613_v28 = vld [vmem:[%s759_s0 + $0x38] sm:$0xff]   ;;  %v61_v29 = vld [vmem:[%s761_s2 + $0x68] sm:$0xff]  ;;  %v60_v30 = vld [vmem:[%s761_s2 + $0x60] sm:$0xff]  ;;  %s637_s0 = smov [#allocation2]  }
  0x1b   :  { %557 = vmatpush3.bf16.msra.mxu0 %v604_v13  ;;  %590 = vmatpush3.bf16.msra.mxu1 %v604_v13  ;;  %v63_v31 = vld [vmem:[%s761_s2 + $0x78] sm:$0xff]  ;;  %v62_v32 = vld [vmem:[%s761_s2 + $0x70] sm:$0xff]  ;;  %s422_s2 = sshll.u32 %s637_s0, 4  ;;  %s423_s2 = int_to_ptr.vmem [resolvable:$true] %s422_s2 }
  0x1c   :  { %558 = vmatprep.subr.bf16.mxu0 %v605_v16  ;;  %583 = vmatprep.subr.bf16.mxu1 %v605_v16  ;;  %s614_s21 = scalar_lea.vmem %s423_s2, 1024  ;;  %p619_p1 = scmp.lt.s32.totalorder %s423_s2, %s423_s2 }
  0x1d   :  { %p615_p0 = scmp.ne.s32.totalorder %s423_s2, %s614_s21  ;;  %p620_p2 = scmp.lt.s32.totalorder %s614_s21, %s614_s21 }
  0x1e   :  { %111 = vperm.xlu1 %597, %v57_v21   ;;  %106 = vperm.xlu0 %596, %v56_v22  }
  0x1f   :  { %559 = vmatpush3.bf16.msra.mxu0 %v605_v16  ;;  %591 = vmatpush3.bf16.msra.mxu1 %v605_v16  ;;  %p621_p3 = por %p620_p2, %p619_p1 }
  0x21   :  { %p622_p4 = pnand %p621_p3, %p615_p0 }
  0x22   :  { %561 = vmatmul.mubr.bf16.vlgmr.msra.gmra.mxu0 %v608_v19  ;;  %569 = vmatmul.mubr.bf16.vlgmr.msra.gmra.mxu1 %v609_v20 }
  0x23   :  { %564 = vmatprep.mubr.bf16.mxu0 %v610_v23  ;;  %572 = vmatprep.mubr.bf16.mxu1 %v611_v24 }
  0x24   :  { %121 = vperm.xlu1 %597, %v59_v25   ;;  %116 = vperm.xlu0 %596, %v58_v26  }
  0x28   :  { %131 = vperm.xlu1 %597, %v61_v29   ;;  %126 = vperm.xlu0 %596, %v60_v30  }
  0x2a   :  { %565 = vmatmul.mubr.bf16.gmra.mxu0 %v612_v27  ;;  %573 = vmatmul.mubr.bf16.gmra.mxu1 %v613_v28 }
  0x2c   :  { %141 = vperm.xlu1 %597, %v63_v31   ;;  %136 = vperm.xlu0 %596, %v62_v32  }
  0x81   :  { %v77_v33 = vpop.permute.xlu1 %76  ;;  %v67_v34 = vpop.permute.xlu0 %66 }
  0x85   :  { %v82_v35 = vpop.permute.xlu1 %81  ;;  %v72_v36 = vpop.permute.xlu0 %71 }
  0x91   :  { %v92_v37 = vpop.permute.xlu1 %91  ;;  %v87_v38 = vpop.permute.xlu0 %86 }
  0x95   :  { %v102_v39 = vpop.permute.xlu1 %101  ;;  %v97_v40 = vpop.permute.xlu0 %96 }
  0x99   :  { %v112_v41 = vpop.permute.xlu1 %111  ;;  %v107_v42 = vpop.permute.xlu0 %106 }
  0x9f   :  { %v122_v43 = vpop.permute.xlu1 %121  ;;  %v117_v44 = vpop.permute.xlu0 %116 }
  0xa3   :  { %v132_v51 = vpop.permute.xlu1 %131  ;;  %v127_v52 = vpop.permute.xlu0 %126 }
  0xa7   :  { %v142_v7 = vpop.permute.xlu1 %141  ;;  %v137_v8 = vpop.permute.xlu0 %136 }
  0xe2   :  { %v562_v45 = vpop.f32.mrf.mxu0  ;;  %v570_v46 = vpop.f32.mrf.mxu1 }
  0xe3   :  { %v283_v53 = vadd.f32 %v562_v45, %v77_v33  ;;  %v315_v54 = vadd.f32 %v570_v46, %v117_v44 }
  0xe4   :  { %v274_v47 = vpop.f32.mrf.mxu0  ;;  %v306_v48 = vpop.f32.mrf.mxu1 }
  0xe5   :  { %v275_v57 = vadd.f32 %v274_v47, %v67_v34  ;;  %v307_v58 = vadd.f32 %v306_v48, %v107_v42 }
  0xe6   :  { %v563_v49 = vpop.f32.mrf.mxu0  ;;  %v571_v50 = vpop.f32.mrf.mxu1 }
  0xe7   :  { %v286_v55 = vadd.f32 %v563_v49, %v82_v35  ;;  %v318_v56 = vadd.f32 %v571_v50, %v122_v43 }
  0xe8   :  { %v277_v59 = vpop.f32.mrf.mxu0  ;;  %v309_v60 = vpop.f32.mrf.mxu1 }
  0xe9   :  { %v489_v61 = vpack.c.bf16 %v286_v55, %v283_v53  ;;  %v509_v62 = vpack.c.bf16 %v318_v56, %v315_v54  ;;  %v278_v63 = vadd.f32 %v277_v59, %v72_v36  ;;  %v310_v0 = vadd.f32 %v309_v60, %v112_v41 }
  0xea   :  { %v566_v1 = vpop.f32.mrf.mxu0  ;;  %v574_v2 = vpop.f32.mrf.mxu1 }
  0xeb   :  { %521 = vst [vmem:[#allocation2 + $0x8] sm:$0xff] %v489_v61   ;;  %525 = vst [vmem:[#allocation2 + $0x28] sm:$0xff] %v509_v62   ;;  %v484_v3 = vpack.c.bf16 %v278_v63, %v275_v57  ;;  %v504_v4 = vpack.c.bf16 %v310_v0, %v307_v58  ;;  %v299_v11 = vadd.f32 %v566_v1, %v97_v40 }
  0xec   :  { %v290_v5 = vpop.f32.mrf.mxu0  ;;  %v322_v6 = vpop.f32.mrf.mxu1  ;;  %v331_v12 = vadd.f32 %v574_v2, %v137_v8 }
  0xed   :  { %485 = vst [vmem:[#allocation2] sm:$0xff] %v484_v3   ;;  %524 = vst [vmem:[#allocation2 + $0x20] sm:$0xff] %v504_v4   ;;  %v291_v15 = vadd.f32 %v290_v5, %v87_v38  ;;  %v323_v16 = vadd.f32 %v322_v6, %v127_v52 }
  0xee   :  { %v567_v9 = vpop.f32.mrf.mxu0  ;;  %v575_v10 = vpop.f32.mrf.mxu1 }
  0xef   :  { %v302_v13 = vadd.f32 %v567_v9, %v102_v39  ;;  %v334_v14 = vadd.f32 %v575_v10, %v142_v7 }
  0xf0   :  { %v293_v17 = vpop.f32.mrf.mxu0  ;;  %v325_v18 = vpop.f32.mrf.mxu1 }
  0xf1   :  { %v499_v19 = vpack.c.bf16 %v302_v13, %v299_v11  ;;  %v519_v20 = vpack.c.bf16 %v334_v14, %v331_v12  ;;  %v294_v21 = vadd.f32 %v293_v17, %v92_v37  ;;  %v326_v22 = vadd.f32 %v325_v18, %v132_v51 }
  0xf3   :  { %523 = vst [vmem:[#allocation2 + $0x18] sm:$0xff] %v499_v19   ;;  %527 = vst [vmem:[#allocation2 + $0x38] sm:$0xff] %v519_v20   ;;  %v494_v23 = vpack.c.bf16 %v294_v21, %v291_v15  ;;  %v514_v24 = vpack.c.bf16 %v326_v22, %v323_v16 }
  0xf5   :  { %522 = vst [vmem:[#allocation2 + $0x10] sm:$0xff] %v494_v23   ;;  %526 = vst [vmem:[#allocation2 + $0x30] sm:$0xff] %v514_v24  }
  0xf6   :  { %625 = shalt.err (!%p622_p4)
}
  0xf7   :  { %s638_s22 = smov 64   ;;  %s639_s1 = smov 4  }
  0xf8   :  { %428 = dma.vmem_to_hbm [thread:$0]  %s423_s2, 1024, %s762_s3, [#allocation3], %s638_s22, %s638_s22, %s639_s1  }
  0xf9   :  { %634 = dma.done.wait [#allocation3], 1024  }
  0xfa   :  { %635 = vsyncadd [#allocation3], 4294966272 }
  0xfb   :  { %432 = vsyncpa [#allocation3], 1 }

</bundles_post_ra>
